<compile_context>
chip_gen: v7x
topology: tpu7x:2x2x1
jax: 0.10.0
libtpu: 0.0.40
codegen_flags: <defaults>
</compile_context>

<pallas_src>
import jax
import jax.numpy as jnp
from jax import lax
from jax.experimental import pallas as pl
from jax.experimental.pallas import tpu as pltpu


def _round_up(x, m):
    return ((x + m - 1) // m) * m


def _sublane(dtype):
    # Minimum sublane multiple for dense packing: 8 for 4-byte, 16 for 2-byte,
    # 32 for 1-byte dtypes.
    return max(8, 32 // jnp.dtype(dtype).itemsize)


def _pick_row_tile(Mp, tm_pref):
    """Row tile: full extent when small, else 256 (or 128 if it pads much less)."""
    if Mp <= tm_pref:
        return Mp
    waste_big = _round_up(Mp, tm_pref) - Mp
    waste_small = _round_up(Mp, 128) - Mp
    if tm_pref > 128 and waste_small < waste_big:
        return 128
    return tm_pref


def gate_kernel(x_ref, w_ref, xg_ref, o_ref, acc_ref):
    # x_ref  : (tm, tk)  input-row tile, K-chunk of feature columns
    # w_ref  : (tk, tn)  weight block, already in (K, N) layout
    # xg_ref : (tm, tn)  x columns matching this output tile (gate operand)
    # o_ref  : (tm, tn)  output tile
    # acc_ref: (tm, tn)  f32 accumulator (VMEM scratch, persists across k)
    k = pl.program_id(2)

    @pl.when(k == 0)
    def _():
        acc_ref[...] = jnp.zeros_like(acc_ref)

    # MXU: native-dtype operands, f32 accumulation.
    acc_ref[...] += lax.dot_general(
        x_ref[...], w_ref[...],
        (((1,), (0,)), ((), ())),
        preferred_element_type=jnp.float32,
    )

    @pl.when(k == pl.num_programs(2) - 1)
    def _():
        # EUP/VPU: sigmoid gate on the matching x columns, applied once.
        gate = jax.nn.sigmoid(xg_ref[...].astype(jnp.float32))
        o_ref[...] = (acc_ref[...] * gate).astype(o_ref.dtype)


def gate_forward(x, weight, *, tm=256, tn=1024, tk=512):
    """Gate forward: (x @ W^T) * sigmoid(x).

    x:      (batch, len, dim)
    weight: (dim, dim) in nn.Linear layout (out_features, in_features)
    """
    B, L, D = x.shape
    M = B * L
    dtype = x.dtype
    itemsize = jnp.dtype(dtype).itemsize

    # Keep the MXU fed with a single operand dtype (don't silently promote).
    if weight.dtype != dtype:
        weight = weight.astype(dtype)

    # ---- feature (lane) padding / N tile ----------------------------------
    Dp = _round_up(D, 128)
    tn = min(tn, Dp)
    if Dp % tn:
        Dp = _round_up(D, tn)

    # ---- row (sublane) padding / M tile, dtype-aware ----------------------
    sub = _sublane(dtype)
    Mp = _round_up(M, sub)
    tm = _pick_row_tile(Mp, tm)
    Mp = _round_up(Mp, tm)

    # ---- K tile: must divide Dp (Dp is a multiple of tn, tn of 128) --------
    if Dp % tk:
        tk = tn  # tn always divides Dp

    num_m = Mp // tm
    num_n = Dp // tn
    # v7x megacore: avoid a single-output-tile grid when we can cheaply split N.
    if num_m == 1 and num_n == 1 and Dp >= 256 and (Dp // 2) % 128 == 0:
        tn = Dp // 2
        num_n = 2
        if Dp % tk:
            tk = tn
    num_k = Dp // tk

    # ---- pad operands (skipped when already aligned) -----------------------
    x2d = x.reshape(M, D)
    if (Mp, Dp) != (M, D):
        x2d = jnp.pad(x2d, ((0, Mp - M), (0, Dp - D)))
    # One-time transpose to (in, out) = (K, N); zero-pad keeps valid cols exact.
    wT = weight.T
    if Dp != D:
        wT = jnp.pad(wT, ((0, Dp - D), (0, Dp - D)))

    cost = pl.CostEstimate(
        flops=2 * Mp * Dp * Dp,
        transcendentals=Mp * Dp,
        bytes_accessed=(num_n * Mp * Dp        # x re-read per column tile
                        + num_m * Dp * Dp      # weight re-read per row tile
                        + Mp * Dp              # gate read
                        + Mp * Dp) * itemsize  # output write
    )

    out2d = pl.pallas_call(
        gate_kernel,
        out_shape=jax.ShapeDtypeStruct((Mp, Dp), dtype),
        grid_spec=pltpu.PrefetchScalarGridSpec(
            num_scalar_prefetch=0,
            grid=(num_m, num_n, num_k),
            in_specs=[
                pl.BlockSpec((tm, tk), lambda i, j, k: (i, k)),  # x (M, K) tile
                pl.BlockSpec((tk, tn), lambda i, j, k: (k, j)),  # W^T (K, N) tile
                pl.BlockSpec((tm, tn), lambda i, j, k: (i, j)),  # gate slice of x
            ],
            out_specs=pl.BlockSpec((tm, tn), lambda i, j, k: (i, j)),
            scratch_shapes=[pltpu.VMEM((tm, tn), jnp.float32)],
        ),
        compiler_params=pltpu.CompilerParams(
            dimension_semantics=("parallel", "parallel", "arbitrary"),
            vmem_limit_bytes=32 * 1024 * 1024,
        ),
        cost_estimate=cost,
    )(x2d, wT, x2d)

    if (Mp, Dp) != (M, D):
        out2d = out2d[:M, :D]
    return out2d.reshape(B, L, D)


if __name__ == "__main__":
    # Small shapes consistent with the module: batch * len * dim
    B, L, D = 2, 8, 32

    key = jax.random.PRNGKey(0)
    kx, kw = jax.random.split(key)

    x = jax.random.normal(kx, (B, L, D), dtype=jnp.float32)
    # Deterministic init mimicking nn.Linear default: U(-1/sqrt(in), 1/sqrt(in))
    bound = 1.0 / (D ** 0.5)
    weight = jax.random.uniform(kw, (D, D), dtype=jnp.float32,
                                minval=-bound, maxval=bound)

    out = gate_forward(x, weight)
    out = jax.block_until_ready(out)

    # Pure-JAX reference (high-precision matmul so the check is meaningful)
    ref = jnp.einsum("bld,od->blo", x, weight,
                     precision=lax.Precision.HIGHEST) * jax.nn.sigmoid(x)
    assert out.shape == (B, L, D)
    assert jnp.allclose(out, ref, atol=1e-4, rtol=1e-4), (
        float(jnp.max(jnp.abs(out - ref))))

    print("KERNEL_OK")
</pallas_src>

<mosaic_0001>
module attributes {stable_mosaic.version = 11 : i64} {
  func.func @gate_kernel(%arg0: i32, %arg1: i32, %arg2: i32, %arg3: memref<16x128xf32, #tpu.memory_space<vmem>>, %arg4: memref<128x128xf32, #tpu.memory_space<vmem>>, %arg5: memref<16x128xf32, #tpu.memory_space<vmem>>, %arg6: memref<16x128xf32, #tpu.memory_space<vmem>>, %arg7: memref<16x128xf32, #tpu.memory_space<vmem>>) attributes {dimension_semantics = [#tpu.dimension_semantics<parallel>, #tpu.dimension_semantics<parallel>, #tpu.dimension_semantics<arbitrary>], iteration_bounds = array<i64: 1, 1, 1>, scalar_prefetch = 0 : i64, scratch_operands = 1 : i64, tpu.core_type = #tpu.core_type<tc>, window_params = [{transform_indices = @transform_0, window_bounds = array<i64: 16, 128>}, {transform_indices = @transform_1, window_bounds = array<i64: 128, 128>}, {transform_indices = @transform_2, window_bounds = array<i64: 16, 128>}, {transform_indices = @transform_3, window_bounds = array<i64: 16, 128>}]} {
    %c0_i32 = arith.constant 0 : i32
    %0 = arith.cmpi eq, %arg2, %c0_i32 : i32
    %1 = arith.extui %0 : i1 to i32
    %c0_i32_0 = arith.constant 0 : i32
    %2 = arith.cmpi ne, %1, %c0_i32_0 : i32
    scf.if %2 {
      %cst_10 = arith.constant 0.000000e+00 : f32
      %12 = vector.broadcast %cst_10 : f32 to vector<16x128xf32>
      %c0_11 = arith.constant 0 : index
      %c0_12 = arith.constant 0 : index
      %13 = vector.load %arg7[%c0_11, %c0_12] : memref<16x128xf32, #tpu.memory_space<vmem>>, vector<16x128xf32>
      tpu.vector_store %arg7[%c0_11, %c0_12], %12 {strides = array<i32>} : memref<16x128xf32, #tpu.memory_space<vmem>>, vector<16x128xf32>,
    } else {
    }
    %c0 = arith.constant 0 : index
    %c0_1 = arith.constant 0 : index
    %3 = vector.load %arg7[%c0, %c0_1] : memref<16x128xf32, #tpu.memory_space<vmem>>, vector<16x128xf32>
    %c0_2 = arith.constant 0 : index
    %c0_3 = arith.constant 0 : index
    %4 = vector.load %arg3[%c0_2, %c0_3] : memref<16x128xf32, #tpu.memory_space<vmem>>, vector<16x128xf32>
    %c0_4 = arith.constant 0 : index
    %c0_5 = arith.constant 0 : index
    %5 = vector.load %arg4[%c0_4, %c0_5] : memref<128x128xf32, #tpu.memory_space<vmem>>, vector<128x128xf32>
    %cst = arith.constant dense<0.000000e+00> : vector<16x128xf32>
    %6 = tpu.matmul %4, %5, %cst {dimension_numbers = #tpu.dot_dimension_numbers<[1], [0], [0], [1], [0, 0, 1, 1], [], []>} : vector<16x128xf32>, vector<128x128xf32>, vector<16x128xf32> -> vector<16x128xf32>
    %7 = arith.addf %3, %6 : vector<16x128xf32>
    %c0_6 = arith.constant 0 : index
    %c0_7 = arith.constant 0 : index
    %8 = vector.load %arg7[%c0_6, %c0_7] : memref<16x128xf32, #tpu.memory_space<vmem>>, vector<16x128xf32>
    tpu.vector_store %arg7[%c0_6, %c0_7], %7 {strides = array<i32>} : memref<16x128xf32, #tpu.memory_space<vmem>>, vector<16x128xf32>,
    %c0_i32_8 = arith.constant 0 : i32
    %9 = arith.cmpi eq, %arg2, %c0_i32_8 : i32
    %10 = arith.extui %9 : i1 to i32
    %c0_i32_9 = arith.constant 0 : i32
    %11 = arith.cmpi ne, %10, %c0_i32_9 : i32
    scf.if %11 {
      %c0_10 = arith.constant 0 : index
      %c0_11 = arith.constant 0 : index
      %12 = vector.load %arg5[%c0_10, %c0_11] : memref<16x128xf32, #tpu.memory_space<vmem>>, vector<16x128xf32>
      %13 = arith.negf %12 : vector<16x128xf32>
      %14 = math.exp %13 : vector<16x128xf32>
      %cst_12 = arith.constant 1.000000e+00 : f32
      %15 = vector.broadcast %cst_12 : f32 to vector<16x128xf32>
      %16 = arith.addf %15, %14 : vector<16x128xf32>
      %17 = arith.divf %15, %16 : vector<16x128xf32>
      %c0_13 = arith.constant 0 : index
      %c0_14 = arith.constant 0 : index
      %18 = vector.load %arg7[%c0_13, %c0_14] : memref<16x128xf32, #tpu.memory_space<vmem>>, vector<16x128xf32>
      %19 = arith.mulf %18, %17 : vector<16x128xf32>
      %c0_15 = arith.constant 0 : index
      %c0_16 = arith.constant 0 : index
      %20 = vector.load %arg6[%c0_15, %c0_16] : memref<16x128xf32, #tpu.memory_space<vmem>>, vector<16x128xf32>
      tpu.vector_store %arg6[%c0_15, %c0_16], %19 {strides = array<i32>} : memref<16x128xf32, #tpu.memory_space<vmem>>, vector<16x128xf32>,
    } else {
    }
    return
  }
  func.func @transform_0(%arg0: i32, %arg1: i32, %arg2: i32) -> (i32, i32) {
    %c0_i32 = arith.constant 0 : i32
    return %arg0, %arg2 : i32, i32
  }
  func.func @transform_1(%arg0: i32, %arg1: i32, %arg2: i32) -> (i32, i32) {
    %c0_i32 = arith.constant 0 : i32
    return %arg2, %arg1 : i32, i32
  }
  func.func @transform_2(%arg0: i32, %arg1: i32, %arg2: i32) -> (i32, i32) {
    %c0_i32 = arith.constant 0 : i32
    return %arg0, %arg1 : i32, i32
  }
  func.func @transform_3(%arg0: i32, %arg1: i32, %arg2: i32) -> (i32, i32) {
    %c0_i32 = arith.constant 0 : i32
    return %arg0, %arg1 : i32, i32
  }
}

</mosaic_0001>

<bundles_post_ra>
// kernel: tpu_custom_call.1
= control target key start
LH: loop header
LB: loop body
LE: loop exit
PB: predicated region body
PF: predicated region fallthrough
CT: control target
= control target key end

     0   :  { %8 = vsyncpa [#allocation4], 0  ;;  %s490_s0 = inlined_call_operand.hbm [shape: f32[16,128], index: 0, kind: input, shape index: {}]   ;;  %s491_s1 = inlined_call_operand.hbm [shape: f32[128,128], index: 1, kind: input, shape index: {}]   ;;  %s492_s2 = inlined_call_operand.hbm [shape: f32[16,128], index: 2, kind: input, shape index: {}]   ;;  %s493_s3 = inlined_call_operand.hbm [shape: f32[16,128], index: 3, kind: output, shape index: {}]  }
   0x1   :  { %9 = vsyncpa [#allocation7], 0 }
   0x2   :  { %10 = vsyncpa [#allocation5], 0  ;;  %s397_s12 = smov [#allocation6]   ;;  %s398_s14 = smov [#allocation3]  }
   0x3   :  { %s28_s13 = sshll.u32 %s397_s12, 4  ;;  %s16_s15 = sshll.u32 %s398_s14, 4  ;;  %s29_s13 = int_to_ptr.vmem [resolvable:$true] %s28_s13  ;;  %s423_s15 = int_to_ptr.vmem [resolvable:$true] %s16_s15 }
   0x4   :  { %s303_s18 = scalar_lea.hbm %s491_s1, 2048 }
   0x5   :  { %p304_p0 = scmp.ne.s32.totalorder %s491_s1, %s303_s18  ;;  %p307_p1 = scmp.lt.u32.totalorder %s303_s18, %s491_s1 }
   0x7   :  { %p309_p2 = pnand %p307_p1, %p304_p0 }
   0x9   :  { %312 = shalt.err (!%p309_p2)
}
   0xa   :  { %s313_s23 = scalar_lea.vmem %s29_s13, 2048  ;;  %p318_p4 = scmp.lt.s32.totalorder %s29_s13, %s29_s13 }
   0xb   :  { %p314_p3 = scmp.ne.s32.totalorder %s29_s13, %s313_s23  ;;  %p319_p5 = scmp.lt.s32.totalorder %s313_s23, %s313_s23 }
   0xd   :  { %p320_p6 = por %p319_p5, %p318_p4 }
   0xf   :  { %p321_p7 = pnand %p320_p6, %p314_p3 }
  0x11   :  { %324 = shalt.err (!%p321_p7)
}
  0x12   :  { %s399_s24 = smov 128   ;;  %s400_s25 = smov 8  }
  0x13   :  { %34 = dma.hbm_to_vmem [thread:$0]  %s491_s1, 2048, %s29_s13, [#allocation7], %s399_s24, %s399_s24, %s400_s25  }
  0x14   :  { %s325_s30 = scalar_lea.hbm %s490_s0, 256 }
  0x15   :  { %p326_p8 = scmp.ne.s32.totalorder %s490_s0, %s325_s30  ;;  %p329_p9 = scmp.lt.u32.totalorder %s325_s30, %s490_s0 }
  0x17   :  { %p331_p10 = pnand %p329_p9, %p326_p8 }
  0x19   :  { %334 = shalt.err (!%p331_p10)
}
  0x1a   :  { %s335_s8 = scalar_lea.vmem %s423_s15, 256  ;;  %p340_p12 = scmp.lt.s32.totalorder %s423_s15, %s423_s15 }
  0x1b   :  { %p336_p11 = scmp.ne.s32.totalorder %s423_s15, %s335_s8  ;;  %p341_p13 = scmp.lt.s32.totalorder %s335_s8, %s335_s8 }
  0x1d   :  { %p342_p0 = por %p341_p13, %p340_p12 }
  0x1f   :  { %p343_p1 = pnand %p342_p0, %p336_p11 }
  0x21   :  { %346 = shalt.err (!%p343_p1)
}
  0x22   :  { %22 = dma.hbm_to_vmem [thread:$0]  %s490_s0, 256, %s423_s15, [#allocation4], %s399_s24, %s399_s24, %s400_s25  }
  0x23   :  { %s401_s10 = smov [#allocation8]   ;;  %s347_s14 = scalar_lea.hbm %s492_s2, 256 }
  0x24   :  { %s40_s11 = sshll.u32 %s401_s10, 4  ;;  %p348_p2 = scmp.ne.s32.totalorder %s492_s2, %s347_s14  ;;  %s41_s11 = int_to_ptr.vmem [resolvable:$true] %s40_s11 }
  0x25   :  { %p351_p3 = scmp.lt.u32.totalorder %s347_s14, %s492_s2 }
  0x27   :  { %p353_p4 = pnand %p351_p3, %p348_p2 }
  0x29   :  { %356 = shalt.err (!%p353_p4)
}
  0x2a   :  { %s357_s20 = scalar_lea.vmem %s41_s11, 256  ;;  %p362_p6 = scmp.lt.s32.totalorder %s41_s11, %s41_s11 }
  0x2b   :  { %p358_p5 = scmp.ne.s32.totalorder %s41_s11, %s357_s20  ;;  %p363_p7 = scmp.lt.s32.totalorder %s357_s20, %s357_s20 }
  0x2d   :  { %p364_p8 = por %p363_p7, %p362_p6 }
  0x2f   :  { %p365_p9 = pnand %p364_p8, %p358_p5 }
  0x31   :  { %368 = shalt.err (!%p365_p9)
}
  0x32   :  { %46 = dma.hbm_to_vmem [thread:$0]  %s492_s2, 256, %s41_s11, [#allocation7], %s399_s24, %s399_s24, %s400_s25  }
  0x33   :  { %391 = dma.done.wait [#allocation4], 256  }
  0x34   :  { %392 = vsyncadd [#allocation4], 4294967040 }
  0x35   :  { %393 = dma.done.wait [#allocation7], 2304  }
  0x36   :  { %394 = vsyncadd [#allocation7], 4294964992  ;;  %v66_v0 = vld [vmem:[#allocation6] sm:$0xff]  ;;  %v67_v1 = vld [vmem:[#allocation6 + $0x8] sm:$0xff]  ;;  %s402_s2 = smov [#allocation9]  }
  0x37   :  { %v68_v2 = vld [vmem:[#allocation6 + $0x10] sm:$0xff]  ;;  %v257_v3 = vpack.c.bf16 %v67_v1, %v66_v0  ;;  %v69_v4 = vld [vmem:[#allocation6 + $0x18] sm:$0xff]  ;;  %v70_v6 = vld [vmem:[#allocation6 + $0x20] sm:$0xff]  ;;  %s189_s21 = sshll.u32 %s402_s2, 4  ;;  %s190_s21 = int_to_ptr.vmem [resolvable:$true] %s189_s21 }
  0x38   :  { %v261_v5 = vpack.c.bf16 %v69_v4, %v68_v2  ;;  %v71_v7 = vld [vmem:[#allocation6 + $0x28] sm:$0xff]  ;;  %v64_v9 = vld [vmem:[#allocation3] sm:$0xff]  ;;  %v73_v11 = vld [vmem:[#allocation6 + $0x38] sm:$0xff]  ;;  %s369_s22 = scalar_lea.vmem %s190_s21, 256  ;;  %p374_p11 = scmp.lt.s32.totalorder %s190_s21, %s190_s21 }
  0x39   :  { %258 = vmatprep.subr.bf16.mxu0 %v257_v3  ;;  %v265_v8 = vpack.c.bf16 %v71_v7, %v70_v6  ;;  %v72_v10 = vld [vmem:[#allocation6 + $0x30] sm:$0xff]  ;;  %254 = vmatprep.mubr.f32.mxu0 %v64_v9  ;;  %v74_v13 = vld [vmem:[#allocation6 + $0x40] sm:$0xff]  ;;  %v75_v14 = vld [vmem:[#allocation6 + $0x48] sm:$0xff]  ;;  %p370_p10 = scmp.ne.s32.totalorder %s190_s21, %s369_s22  ;;  %p375_p12 = scmp.lt.s32.totalorder %s369_s22, %s369_s22 }
  0x3a   :  { %260 = vmatpush3.bf16.msra.mxu0 %v257_v3  ;;  %v269_v12 = vpack.c.bf16 %v73_v11, %v72_v10  ;;  %v273_v15 = vpack.c.bf16 %v75_v14, %v74_v13  ;;  %v76_v16 = vld [vmem:[#allocation6 + $0x50] sm:$0xff]  ;;  %v77_v17 = vld [vmem:[#allocation6 + $0x58] sm:$0xff]  ;;  %v78_v19 = vld [vmem:[#allocation6 + $0x60] sm:$0xff] }
  0x3b   :  { %262 = vmatprep.subr.bf16.mxu0 %v261_v5  ;;  %v277_v18 = vpack.c.bf16 %v77_v17, %v76_v16  ;;  %v79_v20 = vld [vmem:[#allocation6 + $0x68] sm:$0xff]  ;;  %v80_v22 = vld [vmem:[#allocation6 + $0x70] sm:$0xff]  ;;  %v81_v23 = vld [vmem:[#allocation6 + $0x78] sm:$0xff]  ;;  %p376_p13 = por %p375_p12, %p374_p11 }
  0x3c   :  { %v281_v21 = vpack.c.bf16 %v79_v20, %v78_v19  ;;  %v285_v24 = vpack.c.bf16 %v81_v23, %v80_v22  ;;  %v65_v25 = vld [vmem:[#allocation3 + $0x8] sm:$0xff]  ;;  %v165_v26 = vld [vmem:[#allocation8 + $0x8] sm:$0xff]  ;;  %v164_v27 = vld [vmem:[#allocation8] sm:$0xff] }
  0x3d   :  { %v203_v28 = vmul.f32 -1.442695, %v165_v26  ;;  %v202_v29 = vmul.f32 -1.442695, %v164_v27  ;;  %p377_p0 = pnand %p376_p13, %p370_p10 }
  0x3e   :  { %264 = vmatpush3.bf16.msra.mxu0 %v261_v5 }
  0x3f   :  { %266 = vmatprep.subr.bf16.mxu0 %v265_v8  ;;  %295 = vpow2.f32 %v203_v28 }
  0x40   :  { %297 = vpow2.f32 %v202_v29 }
  0x42   :  { %268 = vmatpush3.bf16.msra.mxu0 %v265_v8 }
  0x43   :  { %270 = vmatprep.subr.bf16.mxu0 %v269_v12 }
  0x46   :  { %272 = vmatpush3.bf16.msra.mxu0 %v269_v12 }
  0x47   :  { %274 = vmatprep.subr.bf16.mxu0 %v273_v15 }
  0x49   :  { %v296_v30 = vpop.eup %295 }
  0x4a   :  { %276 = vmatpush3.bf16.msra.mxu0 %v273_v15  ;;  %v298_v31 = vpop.eup %297  ;;  %v173_v32 = vadd.f32 1.0, %v296_v30 }
  0x4b   :  { %278 = vmatprep.subr.bf16.mxu0 %v277_v18  ;;  %v172_v33 = vadd.f32 1.0, %v298_v31 }
  0x4c   :  { %299 = vrcp.f32 %v173_v32 }
  0x4d   :  { %301 = vrcp.f32 %v172_v33 }
  0x4e   :  { %280 = vmatpush3.bf16.msra.mxu0 %v277_v18 }
  0x4f   :  { %282 = vmatprep.subr.bf16.mxu0 %v281_v21 }
  0x52   :  { %284 = vmatpush3.bf16.msra.mxu0 %v281_v21 }
  0x53   :  { %286 = vmatprep.subr.bf16.mxu0 %v285_v24 }
  0x56   :  { %288 = vmatpush3.bf16.msra.mxu0 %v285_v24  ;;  %v300_v34 = vpop.eup %299 }
  0x57   :  { %v302_v35 = vpop.eup %301 }
  0x59   :  { %255 = vmatmul.mubr.f32.vlgmr.msra.gmra.mrb[0].mxu0 %v65_v25 }
 0x12c   :  { %v256_v36 = vpop.f32.mrb[0].mxu0 }
 0x12d   :  { %v181_v37 = vmul.f32 %v300_v34, %v256_v36  ;;  %v148_v38 = vpop.f32.mrb[1].mxu0 }
 0x12e   :  { %v180_v39 = vmul.f32 %v302_v35, %v148_v38 }
 0x12f   :  { %183 = vst [vmem:[#allocation9 + $0x8] sm:$0xff] %v181_v37 }
 0x130   :  { %182 = vst [vmem:[#allocation9] sm:$0xff] %v180_v39 }
 0x131   :  { %380 = shalt.err (!%p377_p0)
}
 0x132   :  { %s381_s27 = scalar_lea.hbm %s493_s3, 256 }
 0x133   :  { %p382_p1 = scmp.ne.s32.totalorder %s493_s3, %s381_s27  ;;  %p385_p2 = scmp.lt.u32.totalorder %s381_s27, %s493_s3 }
 0x135   :  { %p387_p3 = pnand %p385_p2, %p382_p1 }
 0x137   :  { %390 = shalt.err (!%p387_p3)
}
 0x138   :  { %195 = dma.vmem_to_hbm [thread:$0]  %s190_s21, 256, %s493_s3, [#allocation5], %s399_s24, %s399_s24, %s400_s25  }
 0x139   :  { %395 = dma.done.wait [#allocation5], 256  }
 0x13a   :  { %396 = vsyncadd [#allocation5], 4294967040 }
 0x13b   :  { %199 = vsyncpa [#allocation4], 1 }
 0x13c   :  { %200 = vsyncpa [#allocation7], 1 }
 0x13d   :  { %201 = vsyncpa [#allocation5], 1 }

</bundles_post_ra>
